<compile_context>
chip_gen: v7x
topology: tpu7x:2x2x1
jax: 0.10.0
libtpu: 0.0.40
codegen_flags: <defaults>
</compile_context>

<pallas_src>
import jax
import jax.numpy as jnp
from jax.experimental import pallas as pl
from jax.experimental.pallas import tpu as pltpu


def ca_mlp_kernel(x_ref, w1_ref, b1_ref, w2_ref, b2_ref, o_ref):
    # x_ref: (tm, L)   w1_ref: (L, Lh)  b1_ref: (1, Lh)
    # w2_ref: (Lh, L)  b2_ref: (1, L)   o_ref: (tm, L)
    x = x_ref[...]                                   # native dtype -> MXU
    h = jnp.dot(x, w1_ref[...], preferred_element_type=jnp.float32)
    h = jnp.maximum(h + b1_ref[...].astype(jnp.float32), 0.0)       # fc1 + ReLU
    g = jnp.dot(h.astype(w2_ref.dtype), w2_ref[...],
                preferred_element_type=jnp.float32)
    g = jax.nn.sigmoid(g + b2_ref[...].astype(jnp.float32))         # f32 gate
    o_ref[...] = (x * g).astype(o_ref.dtype)                        # x * sigmoid(...)


def _round_up(a, b):
    return ((a + b - 1) // b) * b


def ca_mlp(x, w1, b1, w2, b2, *, tm=512):
    """x: (..., C).  w1: (C, H) = fc1.weight.T, b1: (H,), w2: (H, C) = fc2.weight.T, b2: (C,)."""
    orig_shape = x.shape
    C = orig_shape[-1]
    H = w1.shape[1]
    M = 1
    for d in orig_shape[:-1]:
        M *= d

    # --- pack k logical rows per kernel row so the lane dim is a full 128 lanes ---
    k = 128 // C if (C < 128 and 128 % C == 0) else 1
    L, Lh = k * C, k * H

    if k > 1:
        w1k = jnp.kron(jnp.eye(k, dtype=w1.dtype), w1)      # (L, Lh) block-diagonal
        w2k = jnp.kron(jnp.eye(k, dtype=w2.dtype), w2)      # (Lh, L) block-diagonal
        b1k = jnp.tile(b1, k).reshape(1, Lh)
        b2k = jnp.tile(b2, k).reshape(1, L)
    else:
        w1k, w2k = w1, w2
        b1k, b2k = b1.reshape(1, H), b2.reshape(1, C)

    # --- row tiling: big tiles for DMA efficiency, >=2 grid steps when possible ---
    mp = pl.cdiv(M, k)                      # packed rows actually needed
    mp_rounded = _round_up(mp, 8)
    target = min(tm, max(256, _round_up(pl.cdiv(mp_rounded, 8), 8)))
    tm_eff = max(8, _round_up(min(target, mp_rounded), 8))
    mp_pad = _round_up(mp, tm_eff)
    m_pad = mp_pad * k

    x2d = x.reshape(M, C)
    if m_pad != M:
        x2d = jnp.pad(x2d, ((0, m_pad - M), (0, 0)))        # zero rows gate to zero
    xp = x2d.reshape(mp_pad, L)                              # free row-major reshape

    grid = (mp_pad // tm_eff,)

    itemsize = jnp.dtype(x.dtype).itemsize
    w_bytes = (w1k.size * w1k.dtype.itemsize + w2k.size * w2k.dtype.itemsize
               + b1k.size * b1k.dtype.itemsize + b2k.size * b2k.dtype.itemsize)
    tile_bytes = tm_eff * L * itemsize
    # 2x double-buffered in + out tiles, 2x weights (conservative), headroom.
    vmem_limit = int(min(max(4 * tile_bytes + 2 * w_bytes + (4 << 20), 16 << 20),
                         64 << 20))

    cost = pl.CostEstimate(
        flops=4 * M * C * H,                       # two matmuls
        transcendentals=M * C,                     # sigmoid
        bytes_accessed=2 * M * C * itemsize + w_bytes,
    )

    out = pl.pallas_call(
        ca_mlp_kernel,
        out_shape=jax.ShapeDtypeStruct((mp_pad, L), x.dtype),
        grid=grid,
        in_specs=[
            pl.BlockSpec((tm_eff, L), lambda i: (i, 0)),     # packed x rows, tiled
            pl.BlockSpec((L, Lh), lambda i: (0, 0)),         # fc1 weight (resident)
            pl.BlockSpec((1, Lh), lambda i: (0, 0)),         # fc1 bias
            pl.BlockSpec((Lh, L), lambda i: (0, 0)),         # fc2 weight (resident)
            pl.BlockSpec((1, L), lambda i: (0, 0)),          # fc2 bias
        ],
        out_specs=pl.BlockSpec((tm_eff, L), lambda i: (i, 0)),
        compiler_params=pltpu.CompilerParams(
            dimension_semantics=("parallel",),
            vmem_limit_bytes=vmem_limit),
        cost_estimate=cost,
        input_output_aliases={0: 0},     # output reuses the packed-x HBM buffer
    )(xp, w1k, b1k, w2k, b2k)

    out = out.reshape(m_pad, C)[:M]
    return out.reshape(orig_shape)


def _ref_ca_mlp(x, w1, b1, w2, b2):
    h = jnp.maximum(x @ w1 + b1, 0.0)
    w = jax.nn.sigmoid(h @ w2 + b2)
    return x * w


if __name__ == "__main__":
    # Small shapes consistent with the module: batch=2, seq=8, in_features=32,
    # hidden_features=64.
    B, N, C, H = 2, 8, 32, 64

    key = jax.random.PRNGKey(0)
    kx, k1, kb1, k2, kb2 = jax.random.split(key, 5)

    x = jax.random.normal(kx, (B, N, C), dtype=jnp.float32)

    # Deterministic parameter init (PyTorch Linear-like uniform bound).
    bound1 = 1.0 / (C ** 0.5)
    bound2 = 1.0 / (H ** 0.5)
    w1 = jax.random.uniform(k1, (C, H), jnp.float32, -bound1, bound1)   # fc1.weight.T
    b1 = jax.random.uniform(kb1, (H,), jnp.float32, -bound1, bound1)    # fc1.bias
    w2 = jax.random.uniform(k2, (H, C), jnp.float32, -bound2, bound2)   # fc2.weight.T
    b2 = jax.random.uniform(kb2, (C,), jnp.float32, -bound2, bound2)    # fc2.bias

    ref = _ref_ca_mlp(x, w1, b1, w2, b2)

    out = ca_mlp(x, w1, b1, w2, b2)
    out = jax.block_until_ready(out)

    assert out.shape == x.shape
    assert jnp.allclose(out, ref, atol=1e-5, rtol=1e-5), "mismatch vs reference"

    print("KERNEL_OK")
</pallas_src>

<mosaic_0001>
module attributes {stable_mosaic.version = 11 : i64} {
  func.func @ca_mlp_kernel(%arg0: i32, %arg1: memref<8x128xf32, #tpu.memory_space<vmem>>, %arg2: memref<128x256xf32, #tpu.memory_space<vmem>>, %arg3: memref<1x256xf32, #tpu.memory_space<vmem>>, %arg4: memref<256x128xf32, #tpu.memory_space<vmem>>, %arg5: memref<1x128xf32, #tpu.memory_space<vmem>>, %arg6: memref<8x128xf32, #tpu.memory_space<vmem>>) attributes {dimension_semantics = [#tpu.dimension_semantics<parallel>], iteration_bounds = array<i64: 1>, scalar_prefetch = 0 : i64, scratch_operands = 0 : i64, tpu.core_type = #tpu.core_type<tc>, window_params = [{transform_indices = @transform_0, window_bounds = array<i64: 8, 128>}, {pipeline_mode = #tpu.pipeline_mode<synchronous>, transform_indices = @transform_1, window_bounds = array<i64: 128, 256>}, {pipeline_mode = #tpu.pipeline_mode<synchronous>, transform_indices = @transform_2, window_bounds = array<i64: 1, 256>}, {pipeline_mode = #tpu.pipeline_mode<synchronous>, transform_indices = @transform_3, window_bounds = array<i64: 256, 128>}, {pipeline_mode = #tpu.pipeline_mode<synchronous>, transform_indices = @transform_4, window_bounds = array<i64: 1, 128>}, {transform_indices = @transform_5, window_bounds = array<i64: 8, 128>}]} {
    %c0 = arith.constant 0 : index
    %c0_0 = arith.constant 0 : index
    %0 = vector.load %arg1[%c0, %c0_0] : memref<8x128xf32, #tpu.memory_space<vmem>>, vector<8x128xf32>
    %c0_1 = arith.constant 0 : index
    %c0_2 = arith.constant 0 : index
    %1 = vector.load %arg2[%c0_1, %c0_2] : memref<128x256xf32, #tpu.memory_space<vmem>>, vector<128x256xf32>
    %cst = arith.constant dense<0.000000e+00> : vector<8x256xf32>
    %2 = tpu.matmul %0, %1, %cst {dimension_numbers = #tpu.dot_dimension_numbers<[1], [0], [0], [1], [0, 0, 1, 1], [], []>} : vector<8x128xf32>, vector<128x256xf32>, vector<8x256xf32> -> vector<8x256xf32>
    %c0_3 = arith.constant 0 : index
    %c0_4 = arith.constant 0 : index
    %3 = vector.load %arg3[%c0_3, %c0_4] : memref<1x256xf32, #tpu.memory_space<vmem>>, vector<1x256xf32>
    %4 = vector.broadcast %3 : vector<1x256xf32> to vector<8x256xf32>
    %5 = arith.addf %2, %4 : vector<8x256xf32>
    %cst_5 = arith.constant 0.000000e+00 : f32
    %6 = vector.broadcast %cst_5 : f32 to vector<8x256xf32>
    %7 = arith.maximumf %5, %6 : vector<8x256xf32>
    %c0_6 = arith.constant 0 : index
    %c0_7 = arith.constant 0 : index
    %8 = vector.load %arg4[%c0_6, %c0_7] : memref<256x128xf32, #tpu.memory_space<vmem>>, vector<256x128xf32>
    %cst_8 = arith.constant dense<0.000000e+00> : vector<8x128xf32>
    %9 = tpu.matmul %7, %8, %cst_8 {dimension_numbers = #tpu.dot_dimension_numbers<[1], [0], [0], [1], [0, 0, 1, 1], [], []>} : vector<8x256xf32>, vector<256x128xf32>, vector<8x128xf32> -> vector<8x128xf32>
    %c0_9 = arith.constant 0 : index
    %c0_10 = arith.constant 0 : index
    %10 = vector.load %arg5[%c0_9, %c0_10] : memref<1x128xf32, #tpu.memory_space<vmem>>, vector<1x128xf32>
    %11 = vector.broadcast %10 : vector<1x128xf32> to vector<8x128xf32>
    %12 = arith.addf %9, %11 : vector<8x128xf32>
    %13 = arith.negf %12 : vector<8x128xf32>
    %14 = math.exp %13 : vector<8x128xf32>
    %cst_11 = arith.constant 1.000000e+00 : f32
    %15 = vector.broadcast %cst_11 : f32 to vector<8x128xf32>
    %16 = arith.addf %15, %14 : vector<8x128xf32>
    %17 = arith.divf %15, %16 : vector<8x128xf32>
    %18 = arith.mulf %0, %17 : vector<8x128xf32>
    %c0_12 = arith.constant 0 : index
    %c0_13 = arith.constant 0 : index
    %19 = vector.load %arg6[%c0_12, %c0_13] : memref<8x128xf32, #tpu.memory_space<vmem>>, vector<8x128xf32>
    tpu.vector_store %arg6[%c0_12, %c0_13], %18 {strides = array<i32>} : memref<8x128xf32, #tpu.memory_space<vmem>>, vector<8x128xf32>,
    return
  }
  func.func @transform_0(%arg0: i32) -> (i32, i32) {
    %c0_i32 = arith.constant 0 : i32
    %c0_i32_0 = arith.constant 0 : i32
    return %arg0, %c0_i32 : i32, i32
  }
  func.func @transform_1(%arg0: i32) -> (i32, i32) {
    %c0_i32 = arith.constant 0 : i32
    %c0_i32_0 = arith.constant 0 : i32
    %c0_i32_1 = arith.constant 0 : i32
    return %c0_i32, %c0_i32_0 : i32, i32
  }
  func.func @transform_2(%arg0: i32) -> (i32, i32) {
    %c0_i32 = arith.constant 0 : i32
    %c0_i32_0 = arith.constant 0 : i32
    %c0_i32_1 = arith.constant 0 : i32
    return %c0_i32, %c0_i32_0 : i32, i32
  }
  func.func @transform_3(%arg0: i32) -> (i32, i32) {
    %c0_i32 = arith.constant 0 : i32
    %c0_i32_0 = arith.constant 0 : i32
    %c0_i32_1 = arith.constant 0 : i32
    return %c0_i32, %c0_i32_0 : i32, i32
  }
  func.func @transform_4(%arg0: i32) -> (i32, i32) {
    %c0_i32 = arith.constant 0 : i32
    %c0_i32_0 = arith.constant 0 : i32
    %c0_i32_1 = arith.constant 0 : i32
    return %c0_i32, %c0_i32_0 : i32, i32
  }
  func.func @transform_5(%arg0: i32) -> (i32, i32) {
    %c0_i32 = arith.constant 0 : i32
    %c0_i32_0 = arith.constant 0 : i32
    return %arg0, %c0_i32 : i32, i32
  }
}

</mosaic_0001>

<bundles_post_ra>
// kernel: tpu_custom_call.1
= control target key start
LH: loop header
LB: loop body
LE: loop exit
PB: predicated region body
PF: predicated region fallthrough
CT: control target
= control target key end

     0   :  { %10 = vsyncpa [#allocation3], 0  ;;  %s612_s0 = inlined_call_operand.hbm [shape: f32[8,128], index: 0, kind: input, shape index: {}, may-alias: {0,5}]   ;;  %s613_s1 = inlined_call_operand.hbm [shape: f32[128,256], index: 1, kind: input, shape index: {}]   ;;  %s614_s2 = inlined_call_operand.vmem [shape: f32[1,256], index: 2, kind: input, shape index: {}]   ;;  %s615_s3 = inlined_call_operand.hbm [shape: f32[256,128], index: 3, kind: input, shape index: {}]   ;;  %s616_s4 = inlined_call_operand.vmem [shape: f32[1,128], index: 4, kind: input, shape index: {}]   ;;  %s617_s5 = inlined_call_operand.hbm [shape: f32[8,128], index: 5, kind: output, shape index: {}, may-alias: {0,5}]  }
   0x1   :  { %11 = vsyncpa [#allocation6], 0 }
   0x2   :  { %12 = vsyncpa [#allocation4], 0  ;;  %s519_s18 = smov [#allocation5]   ;;  %s425_s22 = scalar_lea.hbm %s613_s1, 4096 }
   0x3   :  { %s28_s19 = sshll.u32 %s519_s18, 4  ;;  %p426_p0 = scmp.ne.s32.totalorder %s613_s1, %s425_s22  ;;  %s29_s19 = int_to_ptr.vmem [resolvable:$true] %s28_s19 }
   0x4   :  { %p429_p1 = scmp.lt.u32.totalorder %s425_s22, %s613_s1 }
   0x6   :  { %p431_p2 = pnand %p429_p1, %p426_p0 }
   0x8   :  { %434 = shalt.err (!%p431_p2)
}
   0x9   :  { %s435_s27 = scalar_lea.vmem %s29_s19, 4096  ;;  %p440_p4 = scmp.lt.s32.totalorder %s29_s19, %s29_s19 }
   0xa   :  { %p436_p3 = scmp.ne.s32.totalorder %s29_s19, %s435_s27  ;;  %p441_p5 = scmp.lt.s32.totalorder %s435_s27, %s435_s27 }
   0xc   :  { %p442_p6 = por %p441_p5, %p440_p4 }
   0xe   :  { %p443_p7 = pnand %p442_p6, %p436_p3 }
  0x10   :  { %446 = shalt.err (!%p443_p7)
}
  0x11   :  { %s520_s28 = smov 256   ;;  %s521_s29 = smov 16  }
  0x12   :  { %34 = dma.hbm_to_vmem [thread:$0]  %s613_s1, 4096, %s29_s19, [#allocation6], %s520_s28, %s520_s28, %s521_s29  }
  0x13   :  { %s522_s7 = smov [#allocation2]   ;;  %s523_s9 = smov [#allocation7]  }
  0x14   :  { %s19_s8 = sshll.u32 %s522_s7, 4  ;;  %s42_s10 = sshll.u32 %s523_s9, 4  ;;  %s20_s8 = int_to_ptr.vmem [resolvable:$true] %s19_s8  ;;  %s43_s10 = int_to_ptr.vmem [resolvable:$true] %s42_s10 }
  0x15   :  { %s447_s13 = scalar_lea.hbm %s612_s0, 128 }
  0x16   :  { %p448_p8 = scmp.ne.s32.totalorder %s612_s0, %s447_s13  ;;  %p451_p9 = scmp.lt.u32.totalorder %s447_s13, %s612_s0 }
  0x18   :  { %p453_p10 = pnand %p451_p9, %p448_p8 }
  0x1a   :  { %456 = shalt.err (!%p453_p10)
}
  0x1b   :  { %s457_s1 = scalar_lea.vmem %s20_s8, 128  ;;  %p462_p12 = scmp.lt.s32.totalorder %s20_s8, %s20_s8 }
  0x1c   :  { %p458_p11 = scmp.ne.s32.totalorder %s20_s8, %s457_s1  ;;  %p463_p13 = scmp.lt.s32.totalorder %s457_s1, %s457_s1 }
  0x1e   :  { %p464_p0 = por %p463_p13, %p462_p12 }
  0x20   :  { %p465_p1 = pnand %p464_p0, %p458_p11 }
  0x22   :  { %468 = shalt.err (!%p465_p1)
}
  0x23   :  { %22 = dma.hbm_to_vmem [thread:$0]  %s612_s0, 128, %s20_s8, [#allocation3]  }
  0x24   :  { %s469_s22 = scalar_lea.hbm %s615_s3, 4096 }
  0x25   :  { %p470_p2 = scmp.ne.s32.totalorder %s615_s3, %s469_s22  ;;  %p473_p3 = scmp.lt.u32.totalorder %s469_s22, %s615_s3 }
  0x27   :  { %p475_p4 = pnand %p473_p3, %p470_p2 }
  0x29   :  { %478 = shalt.err (!%p475_p4)
}
  0x2a   :  { %s479_s27 = scalar_lea.vmem %s43_s10, 4096  ;;  %p484_p6 = scmp.lt.s32.totalorder %s43_s10, %s43_s10 }
  0x2b   :  { %p480_p5 = scmp.ne.s32.totalorder %s43_s10, %s479_s27  ;;  %p485_p7 = scmp.lt.s32.totalorder %s479_s27, %s479_s27 }
  0x2d   :  { %p486_p8 = por %p485_p7, %p484_p6 }
  0x2f   :  { %p487_p9 = pnand %p486_p8, %p480_p5 }
  0x31   :  { %490 = shalt.err (!%p487_p9)
}
  0x32   :  { %s524_s0 = smov 128   ;;  %s525_s28 = smov 8  }
  0x33   :  { %48 = dma.hbm_to_vmem [thread:$0]  %s615_s3, 4096, %s43_s10, [#allocation6], %s524_s0, %s524_s0, %s525_s28  }
  0x34   :  { %513 = dma.done.wait [#allocation3], 128  }
  0x35   :  { %514 = vsyncadd [#allocation3], 4294967168 }
  0x36   :  { %515 = dma.done.wait [#allocation6], 8192  }
  0x37   :  { %516 = vsyncadd [#allocation6], 4294959104  ;;  %v526_v0 = vmov 0.0   ;;  %v62_v1 = vld [vmem:[#allocation5 + $0x8] sm:$0xff]  ;;  %v64_v2 = vld [vmem:[#allocation5 + $0x18] sm:$0xff] }
  0x38   :  { %169 = vmatprep.mubr.f32.mxu0 %v526_v0  ;;  %v61_v3 = vld [vmem:[#allocation5] sm:$0xff]  ;;  %v348_v4 = vpack.c.bf16 %v64_v2, %v62_v1  ;;  %v63_v5 = vld [vmem:[#allocation5 + $0x10] sm:$0xff]  ;;  %v66_v6 = vld [vmem:[#allocation5 + $0x28] sm:$0xff] }
  0x39   :  { %v68_v7 = vld [vmem:[#allocation5 + $0x38] sm:$0xff]  ;;  %v350_v8 = vpack.c.bf16 %v63_v5, %v61_v3  ;;  %v65_v10 = vld [vmem:[#allocation5 + $0x20] sm:$0xff]  ;;  %v67_v11 = vld [vmem:[#allocation5 + $0x30] sm:$0xff] }
  0x3a   :  { %v352_v9 = vpack.c.bf16 %v68_v7, %v66_v6  ;;  %v70_v12 = vld [vmem:[#allocation5 + $0x48] sm:$0xff]  ;;  %349 = vmatprep.subr.bf16.mxu0 %v348_v4  ;;  %v72_v13 = vld [vmem:[#allocation5 + $0x58] sm:$0xff]  ;;  %v354_v14 = vpack.c.bf16 %v67_v11, %v65_v10  ;;  %v69_v16 = vld [vmem:[#allocation5 + $0x40] sm:$0xff] }
  0x3b   :  { %351 = vmatpush1.bf16.msra.mxu0 %v350_v8  ;;  %v356_v15 = vpack.c.bf16 %v72_v13, %v70_v12  ;;  %v71_v17 = vld [vmem:[#allocation5 + $0x50] sm:$0xff]  ;;  %v74_v18 = vld [vmem:[#allocation5 + $0x68] sm:$0xff]  ;;  %v76_v19 = vld [vmem:[#allocation5 + $0x78] sm:$0xff] }
  0x3c   :  { %353 = vmatprep.subr.bf16.mxu0 %v352_v9  ;;  %v358_v20 = vpack.c.bf16 %v71_v17, %v69_v16  ;;  %v360_v21 = vpack.c.bf16 %v76_v19, %v74_v18  ;;  %v73_v22 = vld [vmem:[#allocation5 + $0x60] sm:$0xff]  ;;  %v75_v23 = vld [vmem:[#allocation5 + $0x70] sm:$0xff]  ;;  %v78_v24 = vld [vmem:[#allocation5 + $0x88] sm:$0xff] }
  0x3d   :  { %v80_v25 = vld [vmem:[#allocation5 + $0x98] sm:$0xff]  ;;  %v77_v26 = vld [vmem:[#allocation5 + $0x80] sm:$0xff]  ;;  %v79_v27 = vld [vmem:[#allocation5 + $0x90] sm:$0xff]  ;;  %v362_v31 = vpack.c.bf16 %v75_v23, %v73_v22 }
  0x3e   :  { %v194_v28 = vld [vmem:[#allocation7 + $0x80] sm:$0xff]  ;;  %v195_v29 = vld [vmem:[#allocation7 + $0x88] sm:$0xff]  ;;  %v196_v34 = vld [vmem:[#allocation7 + $0x90] sm:$0xff]  ;;  %v364_v36 = vpack.c.bf16 %v80_v25, %v78_v24  ;;  %v366_v46 = vpack.c.bf16 %v79_v27, %v77_v26 }
  0x3f   :  { %355 = vmatpush1.bf16.msra.mxu0 %v354_v14  ;;  %v178_v30 = vld [vmem:[#allocation7] sm:$0xff]  ;;  %v380_v32 = vpack.c.bf16 %v195_v29, %v194_v28  ;;  %v179_v33 = vld [vmem:[#allocation7 + $0x8] sm:$0xff]  ;;  %v197_v35 = vld [vmem:[#allocation7 + $0x98] sm:$0xff] }
  0x40   :  { %357 = vmatprep.subr.bf16.mxu0 %v356_v15  ;;  %v382_v37 = vpack.c.bf16 %v179_v33, %v178_v30  ;;  %v384_v38 = vpack.c.bf16 %v197_v35, %v196_v34  ;;  %v180_v39 = vld [vmem:[#allocation7 + $0x10] sm:$0xff]  ;;  %v181_v40 = vld [vmem:[#allocation7 + $0x18] sm:$0xff]  ;;  %v198_v41 = vld [vmem:[#allocation7 + $0xa0] sm:$0xff]  ;;  %v95_v34 = vlaneseq }
  0x41   :  { %v82_v42 = vld [vmem:[#allocation5 + $0xa8] sm:$0xff]  ;;  %v84_v43 = vld [vmem:[#allocation5 + $0xb8] sm:$0xff]  ;;  %381 = vmatprep.subr.bf16.mxu1 %v380_v32  ;;  %v386_v45 = vpack.c.bf16 %v181_v40, %v180_v39  ;;  %v81_v47 = vld [vmem:[#allocation5 + $0xa0] sm:$0xff] }
  0x42   :  { %v199_v44 = vld [vmem:[#allocation7 + $0xa8] sm:$0xff]  ;;  %383 = vmatpush3.bf16.msra.mxu1 %v382_v37  ;;  %v182_v49 = vld [vmem:[#allocation7 + $0x20] sm:$0xff]  ;;  %v368_v51 = vpack.c.bf16 %v84_v43, %v82_v42  ;;  %v83_v52 = vld [vmem:[#allocation5 + $0xb0] sm:$0xff]  ;;  %v96_v35 = vshrl.u32 %v95_v34, 7 }
  0x43   :  { %359 = vmatpush1.bf16.msra.mxu0 %v358_v20  ;;  %385 = vmatprep.subr.bf16.mxu1 %v384_v38  ;;  %v388_v48 = vpack.c.bf16 %v199_v44, %v198_v41  ;;  %v183_v50 = vld [vmem:[#allocation7 + $0x28] sm:$0xff]  ;;  %v200_v53 = vld [vmem:[#allocation7 + $0xb0] sm:$0xff]  ;;  %v201_v54 = vld [vmem:[#allocation7 + $0xb8] sm:$0xff]  ;;  %v370_v58 = vpack.c.bf16 %v83_v52, %v81_v47 }
  0x44   :  { %361 = vmatprep.subr.bf16.mxu0 %v360_v21  ;;  %v86_v55 = vld [vmem:[#allocation5 + $0xc8] sm:$0xff]  ;;  %v88_v56 = vld [vmem:[#allocation5 + $0xd8] sm:$0xff]  ;;  %v390_v57 = vpack.c.bf16 %v183_v50, %v182_v49  ;;  %v85_v59 = vld [vmem:[#allocation5 + $0xc0] sm:$0xff]  ;;  %v392_v60 = vpack.c.bf16 %v201_v54, %v200_v53  ;;  %v101_v38 = vsub.s32 1, %v96_v35 }
  0x45   :  { %v184_v61 = vld [vmem:[#allocation7 + $0x30] sm:$0xff]  ;;  %v185_v62 = vld [vmem:[#allocation7 + $0x38] sm:$0xff]  ;;  %v372_v63 = vpack.c.bf16 %v88_v56, %v86_v55  ;;  %v202_v1 = vld [vmem:[#allocation7 + $0xc0] sm:$0xff] }
  0x46   :  { %387 = vmatpush3.bf16.msra.mxu1 %v386_v45  ;;  %v87_v0 = vld [vmem:[#allocation5 + $0xd0] sm:$0xff]  ;;  %v203_v2 = vld [vmem:[#allocation7 + $0xc8] sm:$0xff]  ;;  %v92_v4 = vld [vmem:[#allocation5 + $0xf8] sm:$0xff]  ;;  %v394_v5 = vpack.c.bf16 %v185_v62, %v184_v61 }
  0x47   :  { %363 = vmatpush1.bf16.msra.mxu0 %v362_v31  ;;  %389 = vmatprep.subr.bf16.mxu1 %v388_v48  ;;  %v90_v3 = vld [vmem:[#allocation5 + $0xe8] sm:$0xff]  ;;  %v374_v6 = vpack.c.bf16 %v87_v0, %v85_v59  ;;  %v89_v7 = vld [vmem:[#allocation5 + $0xe0] sm:$0xff]  ;;  %v396_v8 = vpack.c.bf16 %v203_v2, %v202_v1  ;;  %v91_v12 = vld [vmem:[#allocation5 + $0xf0] sm:$0xff] }
  0x48   :  { %365 = vmatprep.subr.bf16.mxu0 %v364_v36  ;;  %v186_v9 = vld [vmem:[#allocation7 + $0x40] sm:$0xff]  ;;  %v187_v10 = vld [vmem:[#allocation7 + $0x48] sm:$0xff]  ;;  %v376_v11 = vpack.c.bf16 %v92_v4, %v90_v3  ;;  %v204_v13 = vld [vmem:[#allocation7 + $0xd0] sm:$0xff]  ;;  %v378_v16 = vpack.c.bf16 %v91_v12, %v89_v7  ;;  %v97_v36 = vsub.s32 0, %v96_v35 }
  0x49   :  { %v205_v14 = vld [vmem:[#allocation7 + $0xd8] sm:$0xff]  ;;  %v398_v15 = vpack.c.bf16 %v187_v10, %v186_v9  ;;  %v188_v18 = vld [vmem:[#allocation7 + $0x50] sm:$0xff]  ;;  %v206_v20 = vld [vmem:[#allocation7 + $0xe0] sm:$0xff] }
  0x4a   :  { %391 = vmatpush3.bf16.msra.mxu1 %v390_v57  ;;  %v400_v17 = vpack.c.bf16 %v205_v14, %v204_v13  ;;  %v189_v19 = vld [vmem:[#allocation7 + $0x58] sm:$0xff]  ;;  %v207_v21 = vld [vmem:[#allocation7 + $0xe8] sm:$0xff]  ;;  %v190_v25 = vld [vmem:[#allocation7 + $0x60] sm:$0xff] }
  0x4b   :  { %367 = vmatpush1.bf16.msra.mxu0 %v366_v46  ;;  %393 = vmatprep.subr.bf16.mxu1 %v392_v60  ;;  %v402_v22 = vpack.c.bf16 %v189_v19, %v188_v18  ;;  %v60_v23 = vld [vmem:[#allocation2] sm:$0xff]  ;;  %v404_v24 = vpack.c.bf16 %v207_v21, %v206_v20  ;;  %v191_v26 = vld [vmem:[#allocation7 + $0x68] sm:$0xff]  ;;  %v208_v28 = vld [vmem:[#allocation7 + $0xf0] sm:$0xff] }
  0x4c   :  { %369 = vmatprep.subr.bf16.mxu0 %v368_v51  ;;  %v406_v27 = vpack.c.bf16 %v191_v26, %v190_v25  ;;  %v209_v29 = vld [vmem:[#allocation7 + $0xf8] sm:$0xff]  ;;  %v192_v31 = vld [vmem:[#allocation7 + $0x70] sm:$0xff] }
  0x4d   :  { %v408_v30 = vpack.c.bf16 %v209_v29, %v208_v28  ;;  %v193_v32 = vld [vmem:[#allocation7 + $0x78] sm:$0xff] }
  0x4e   :  { %395 = vmatpush3.bf16.msra.mxu1 %v394_v5  ;;  %v410_v33 = vpack.c.bf16 %v193_v32, %v192_v31  ;;  %v93_v37 = vld [vmem:[%s614_s2] sm:$0x3]  ;;  %s527_s2 = smov [#allocation8]  }
  0x4f   :  { %371 = vmatpush1.bf16.msra.mxu0 %v370_v58  ;;  %397 = vmatprep.subr.bf16.mxu1 %v396_v8  ;;  %v98_v39 = vrot.slane %v93_v37, %v97_v36  ;;  %v102_v40 = vrot.slane %v93_v37, %v101_v38  ;;  %v311_v48 = vld [vmem:[%s616_s4] ss:$0 sm:$0xff]  ;;  %s301_s9 = sshll.u32 %s527_s2, 4  ;;  %s302_s9 = int_to_ptr.vmem [resolvable:$true] %s301_s9 }
  0x50   :  { %373 = vmatprep.subr.bf16.mxu0 %v372_v63  ;;  %s491_s10 = scalar_lea.vmem %s302_s9, 128  ;;  %p496_p11 = scmp.lt.s32.totalorder %s302_s9, %s302_s9 }
  0x51   :  { %p492_p10 = scmp.ne.s32.totalorder %s302_s9, %s491_s10  ;;  %p497_p12 = scmp.lt.s32.totalorder %s491_s10, %s491_s10 }
  0x52   :  { %399 = vmatpush3.bf16.msra.mxu1 %v398_v15 }
  0x53   :  { %375 = vmatpush1.bf16.msra.mxu0 %v374_v6  ;;  %401 = vmatprep.subr.bf16.mxu1 %v400_v17  ;;  %p498_p13 = por %p497_p12, %p496_p11 }
  0x54   :  { %377 = vmatprep.subr.bf16.mxu0 %v376_v11 }
  0x55   :  { %p499_p0 = pnand %p498_p13, %p492_p10 }
  0x56   :  { %403 = vmatpush3.bf16.msra.mxu1 %v402_v22 }
  0x57   :  { %379 = vmatpush1.bf16.msra.mxu0 %v378_v16  ;;  %405 = vmatprep.subr.bf16.mxu1 %v404_v24 }
  0x5a   :  { %170 = vmatmul.mubr.f32.vlgmr.msra.gmra.mrb[0].mxu0 %v60_v23  ;;  %407 = vmatpush3.bf16.msra.mxu1 %v406_v27 }
  0x5b   :  { %409 = vmatprep.subr.bf16.mxu1 %v408_v30 }
  0x5e   :  { %411 = vmatpush3.bf16.msra.mxu1 %v410_v33 }
 0x12d   :  { %v171_v41 = vpop.f32.mrb[0].mxu0 }
 0x12e   :  { %v172_v42 = vadd.f32 %v171_v41, %v98_v39  ;;  %v173_v43 = vpop.f32.mrb[1].mxu0 }
 0x12f   :  { %v174_v44 = vadd.f32 %v173_v43, %v102_v40 }
 0x130   :  { %v176_v46 = vmax.f32 %v172_v42, 0.0 }
 0x131   :  { %v177_v45 = vmax.f32 %v174_v44, 0.0 }
 0x133   :  { %281 = vmatprep.mubr.f32.mxu1 %v177_v45 }
 0x134   :  { %282 = vmatmul.mubr.f32.vlgmr.msra.gmra.mrb[0].mxu1 %v176_v46 }
 0x207   :  { %v345_v47 = vpop.f32.mrb[0].mxu1 }
 0x208   :  { %v346_v49 = vpop.f32.mrb[1].mxu1 }
 0x209   :  { %v347_v50 = vadd.f32 %v346_v49, %v345_v47 }
 0x20b   :  { %v284_v51 = vadd.f32 %v347_v50, %v311_v48 }
 0x20d   :  { %v312_v52 = vmul.f32 -1.442695, %v284_v51 }
 0x20f   :  { %421 = vpow2.f32 %v312_v52 }
 0x219   :  { %v422_v53 = vpop.eup %421 }
 0x21a   :  { %v290_v54 = vadd.f32 1.0, %v422_v53 }
 0x21c   :  { %423 = vrcp.f32 %v290_v54 }
 0x226   :  { %v424_v55 = vpop.eup %423 }
 0x227   :  { %v293_v56 = vmul.f32 %v424_v55, %v60_v23 }
 0x229   :  { %294 = vst [vmem:[#allocation8] sm:$0xff] %v293_v56 }
 0x22a   :  { %502 = shalt.err (!%p499_p0)
}
 0x22b   :  { %s503_s12 = scalar_lea.hbm %s617_s5, 128 }
 0x22c   :  { %p504_p1 = scmp.ne.s32.totalorder %s617_s5, %s503_s12  ;;  %p507_p2 = scmp.lt.u32.totalorder %s503_s12, %s617_s5 }
 0x22e   :  { %p509_p3 = pnand %p507_p2, %p504_p1 }
 0x230   :  { %512 = shalt.err (!%p509_p3)
}
 0x231   :  { %304 = dma.vmem_to_hbm [thread:$0]  %s302_s9, 128, %s617_s5, [#allocation4]  }
 0x232   :  { %517 = dma.done.wait [#allocation4], 128  }
 0x233   :  { %518 = vsyncadd [#allocation4], 4294967168 }
 0x234   :  { %308 = vsyncpa [#allocation3], 1 }
 0x235   :  { %309 = vsyncpa [#allocation6], 1 }
 0x236   :  { %310 = vsyncpa [#allocation4], 1 }

</bundles_post_ra>
